<compile_context>
chip_gen: v5e
topology: v5e:2x2
jax: 0.10.0
libtpu: 0.0.40
codegen_flags: <defaults>
</compile_context>

<pallas_src>
import jax
import jax.numpy as jnp
from jax.experimental import pallas as pl
from jax.experimental.pallas import tpu as pltpu


def _round_up(x, m):
    return ((x + m - 1) // m) * m


def mlp_kernel(xt_ref, wh_ref, p_ref, o_ref):
    xt = xt_ref[...]          # (F_in, tb)      batch on lanes
    wh = wh_ref[...]          # (F_hid, F_in)   PyTorch layout, used directly
    p = p_ref[...]            # (F_hid, 3)      fused [b_h | w_o | b_o]
    bh = p[:, 0:1]            # (F_hid, 1)
    wo = p[:, 1:2]            # (F_hid, 1)
    bo = p[0:1, 2:3]          # (1, 1)

    # Layer 1 on the MXU: (F_hid, F_in) @ (F_in, tb) -> (F_hid, tb), f32 acc.
    h = jnp.dot(wh, xt, preferred_element_type=jnp.float32) + bh
    h = jnp.maximum(h, 0.0)

    # Layer 2: lane-dense VPU multiply + sublane reduce -> (1, tb), + b_o.
    y = jnp.sum(h * wo, axis=0, keepdims=True) + bo
    o_ref[...] = y.astype(o_ref.dtype)


def mlp_forward(x, hidden_weights, hidden_bias, output_weights, output_bias,
                *, max_batch_tile=16384):
    B, F_in = x.shape
    F_hid = hidden_weights.shape[0]
    assert hidden_weights.shape == (F_hid, F_in)
    assert hidden_bias.shape == (1, F_hid)
    assert output_weights.shape == (1, F_hid)
    assert output_bias.shape == (1, 1)

    # One-time layout plumbing in the wrapper (outside the traced body):
    # batch goes on lanes, so x is presented as (F_in, B).
    xt = x.T                                                    # (F_in, B)

    # Fuse the tiny per-feature params into one (F_hid, 3) block:
    #   col 0 = b_h, col 1 = w_o, col 2 = b_o (row 0) / zeros.
    params = jnp.concatenate(
        [hidden_bias.reshape(F_hid, 1),
         output_weights.reshape(F_hid, 1),
         jnp.pad(output_bias.reshape(1, 1), ((0, F_hid - 1), (0, 0)))],
        axis=1)                                                 # (F_hid, 3)

    # Tile selection (lane dim).  Single fat step for small B (full-dim block,
    # no masking at all); for larger B split ~in half (lane-aligned to 128) so
    # the "parallel" grid axis can shard across v7x's two TensorCores.  The
    # cap keeps per-step VMEM at ~1 MiB even for huge batches.
    # NOTE: f32 only here; sublane dims are the full F_in/F_hid so the (8,128)
    # rule is satisfied for any dtype, but lane tiles are kept 128-aligned.
    if B <= 512:
        tb = B
    else:
        tb = min(max_batch_tile, _round_up(pl.cdiv(B, 2), 128))
    grid = (pl.cdiv(B, tb),)

    out = pl.pallas_call(
        mlp_kernel,
        out_shape=jax.ShapeDtypeStruct((1, B), x.dtype),
        grid_spec=pltpu.PrefetchScalarGridSpec(
            num_scalar_prefetch=0,
            grid=grid,
            in_specs=[
                pl.BlockSpec((F_in, tb), lambda i: (0, i)),     # x^T tile (lane-dense)
                pl.BlockSpec((F_hid, F_in), lambda i: (0, 0)),  # W_h (15, 5)
                pl.BlockSpec((F_hid, 3), lambda i: (0, 0)),     # [b_h | w_o | b_o]
            ],
            out_specs=pl.BlockSpec((1, tb), lambda i: (0, i)),  # lane-dense output slab
        ),
        compiler_params=pltpu.CompilerParams(
            dimension_semantics=("parallel",)),
    )(xt, hidden_weights, params)

    return out.reshape(B, 1)


def init_mlp_params(key, input_features=5, hidden_features=15,
                    dtype=jnp.float32):
    # Mirrors reset_parameters(): every parameter ~ Uniform(-0.001, 0.001).
    stdv = 0.001
    k1, k2, k3, k4 = jax.random.split(key, 4)
    hidden_weights = jax.random.uniform(
        k1, (hidden_features, input_features), dtype, -stdv, stdv)
    hidden_bias = jax.random.uniform(k2, (1, hidden_features), dtype, -stdv, stdv)
    output_weights = jax.random.uniform(k3, (1, hidden_features), dtype, -stdv, stdv)
    output_bias = jax.random.uniform(k4, (1, 1), dtype, -stdv, stdv)
    return hidden_weights, hidden_bias, output_weights, output_bias


def _reference(x, wh, bh, wo, bo):
    return jnp.maximum(x @ wh.T + bh, 0.0) @ wo.T + bo


# TODO(synk): MLPFunction.backward (custom C++ autograd) is not implemented;
# only the forward pass is translated.

if __name__ == "__main__":
    key = jax.random.PRNGKey(0)
    k_params, k_x1, k_x2 = jax.random.split(key, 3)

    input_features, hidden_features = 5, 15
    wh, bh, wo, bo = init_mlp_params(k_params, input_features, hidden_features)

    # Small batch: single grid step, block == full array (no masking path).
    batch = 8
    x_small = jax.random.normal(k_x1, (batch, input_features), jnp.float32)
    out_small = jax.block_until_ready(mlp_forward(x_small, wh, bh, wo, bo))
    ref_small = _reference(x_small, wh, bh, wo, bo)
    assert out_small.shape == (batch, 1)
    assert jnp.allclose(out_small, ref_small, atol=1e-6), "small-batch mismatch"

    # Larger batch: two "parallel" grid steps + ragged (masked) last block.
    big = 2000
    x_big = jax.random.normal(k_x2, (big, input_features), jnp.float32)
    out_big = jax.block_until_ready(mlp_forward(x_big, wh, bh, wo, bo))
    ref_big = _reference(x_big, wh, bh, wo, bo)
    assert out_big.shape == (big, 1)
    assert jnp.allclose(out_big, ref_big, atol=1e-6), "large-batch mismatch"

    print("KERNEL_OK")
</pallas_src>

<mosaic_0001>
module attributes {stable_mosaic.version = 11 : i64} {
  func.func @mlp_kernel(%arg0: i32, %arg1: memref<5x8xf32, #tpu.memory_space<vmem>>, %arg2: memref<15x5xf32, #tpu.memory_space<vmem>>, %arg3: memref<15x3xf32, #tpu.memory_space<vmem>>, %arg4: memref<1x8xf32, #tpu.memory_space<vmem>>) attributes {dimension_semantics = [#tpu.dimension_semantics<parallel>], iteration_bounds = array<i64: 1>, scalar_prefetch = 0 : i64, scratch_operands = 0 : i64, tpu.core_type = #tpu.core_type<tc>, window_params = [{transform_indices = @transform_0, window_bounds = array<i64: 5, 8>}, {pipeline_mode = #tpu.pipeline_mode<synchronous>, transform_indices = @transform_1, window_bounds = array<i64: 15, 5>}, {pipeline_mode = #tpu.pipeline_mode<synchronous>, transform_indices = @transform_2, window_bounds = array<i64: 15, 3>}, {transform_indices = @transform_3, window_bounds = array<i64: 1, 8>}]} {
    %c0 = arith.constant 0 : index
    %c0_0 = arith.constant 0 : index
    %0 = vector.load %arg1[%c0, %c0_0] : memref<5x8xf32, #tpu.memory_space<vmem>>, vector<5x8xf32>
    %c0_1 = arith.constant 0 : index
    %c0_2 = arith.constant 0 : index
    %1 = vector.load %arg2[%c0_1, %c0_2] : memref<15x5xf32, #tpu.memory_space<vmem>>, vector<15x5xf32>
    %c0_3 = arith.constant 0 : index
    %c0_4 = arith.constant 0 : index
    %2 = vector.load %arg3[%c0_3, %c0_4] : memref<15x3xf32, #tpu.memory_space<vmem>>, vector<15x3xf32>
    %3 = vector.extract_strided_slice %2 {offsets = [0, 0], sizes = [15, 1], strides = [1, 1]} : vector<15x3xf32> to vector<15x1xf32>
    %4 = vector.extract_strided_slice %2 {offsets = [0, 1], sizes = [15, 1], strides = [1, 1]} : vector<15x3xf32> to vector<15x1xf32>
    %5 = vector.extract_strided_slice %2 {offsets = [0, 2], sizes = [1, 1], strides = [1, 1]} : vector<15x3xf32> to vector<1x1xf32>
    %cst = arith.constant dense<0.000000e+00> : vector<15x8xf32>
    %6 = tpu.matmul %1, %0, %cst {dimension_numbers = #tpu.dot_dimension_numbers<[1], [0], [0], [1], [0, 0, 1, 1], [], []>} : vector<15x5xf32>, vector<5x8xf32>, vector<15x8xf32> -> vector<15x8xf32>
    %7 = vector.broadcast %3 : vector<15x1xf32> to vector<15x8xf32>
    %8 = arith.addf %6, %7 : vector<15x8xf32>
    %cst_5 = arith.constant 0.000000e+00 : f32
    %9 = vector.broadcast %cst_5 : f32 to vector<15x8xf32>
    %10 = arith.maximumf %8, %9 : vector<15x8xf32>
    %11 = vector.broadcast %4 : vector<15x1xf32> to vector<15x8xf32>
    %12 = arith.mulf %10, %11 : vector<15x8xf32>
    %cst_6 = arith.constant dense<0.000000e+00> : vector<8xf32>
    %13 = vector.multi_reduction <add>, %12, %cst_6 [0] : vector<15x8xf32> to vector<8xf32>
    %14 = vector.shape_cast %13 : vector<8xf32> to vector<1x8xf32>
    %15 = vector.broadcast %5 : vector<1x1xf32> to vector<1x8xf32>
    %16 = arith.addf %14, %15 : vector<1x8xf32>
    %c0_7 = arith.constant 0 : index
    %c0_8 = arith.constant 0 : index
    %17 = vector.load %arg4[%c0_7, %c0_8] : memref<1x8xf32, #tpu.memory_space<vmem>>, vector<1x8xf32>
    tpu.vector_store %arg4[%c0_7, %c0_8], %16 {strides = array<i32>} : memref<1x8xf32, #tpu.memory_space<vmem>>, vector<1x8xf32>,
    return
  }
  func.func @transform_0(%arg0: i32) -> (i32, i32) {
    %c0_i32 = arith.constant 0 : i32
    %c0_i32_0 = arith.constant 0 : i32
    return %c0_i32, %arg0 : i32, i32
  }
  func.func @transform_1(%arg0: i32) -> (i32, i32) {
    %c0_i32 = arith.constant 0 : i32
    %c0_i32_0 = arith.constant 0 : i32
    %c0_i32_1 = arith.constant 0 : i32
    return %c0_i32, %c0_i32_0 : i32, i32
  }
  func.func @transform_2(%arg0: i32) -> (i32, i32) {
    %c0_i32 = arith.constant 0 : i32
    %c0_i32_0 = arith.constant 0 : i32
    %c0_i32_1 = arith.constant 0 : i32
    return %c0_i32, %c0_i32_0 : i32, i32
  }
  func.func @transform_3(%arg0: i32) -> (i32, i32) {
    %c0_i32 = arith.constant 0 : i32
    %c0_i32_0 = arith.constant 0 : i32
    return %c0_i32, %arg0 : i32, i32
  }
}

</mosaic_0001>

<bundles_post_ra>
// kernel: tpu_custom_call.1
= control target key start
LH: loop header
LB: loop body
LE: loop exit
PB: predicated region body
PF: predicated region fallthrough
CT: control target
= control target key end

     0   :  { %vm37_vm0 = vcmask 1044480   ;;  %v148_v2 = vmov 1   ;;  %v149_v3 = vmov 0   ;;  %vm30_vm1 = vcmask 39936   ;;  %s190_s0 = inlined_call_operand.vmem [shape: f32[5,8], index: 0, kind: input, shape index: {}]   ;;  %s191_s1 = inlined_call_operand.vmem [shape: f32[15,5], index: 1, kind: input, shape index: {}]   ;;  %s192_s2 = inlined_call_operand.vmem [shape: f32[15,3], index: 2, kind: input, shape index: {}]   ;;  %s193_s3 = inlined_call_operand.hbm [shape: f32[1,8], index: 3, kind: output, shape index: {}]  }
   0x1   :  { %v15_v0 = vld [vmem:[%s190_s0] sm:$0x1f]  ;;  %119 = vset.pattern.permute.xlu1 %v148_v2  ;;  %118 = vset.pattern.permute.xlu0 %v149_v3  ;;  %v17_v5 = vld [vmem:[%s191_s1 + $0x8] sm:$0x7f] }
   0x2   :  { %v18_v1 = vld [vmem:[%s192_s2] sm:$0xff]  ;;  %110 = vmatpush.msk.msra.mxu0 %vm37_vm0, %v15_v0  ;;  %113 = vmatpush.msk.msra.mxu1 %vm37_vm0, %v15_v0 }
   0x3   :  { %v16_v4 = vld [vmem:[%s191_s1] sm:$0xff] }
   0x4   :  { %8 = vsyncpa [#allocation3], 0  ;;  %67 = vperm.xlu1 %119, %v18_v1   ;;  %22 = vperm.xlu0 %118, %v18_v1   ;;  %v150_v6 = vmov 2   ;;  %v19_v7 = vld [vmem:[%s192_s2 + $0x8] sm:$0x7f]  ;;  %vm76_vm2 = vcmask 64512  }
   0x5   :  { %111 = vmatmul.msk.f32.vlgmr.msra.gmra.mxu0 %vm30_vm1, %v16_v4  ;;  %112 = vmatmul.msk.f32.vlgmr.msra.gmra.mxu1 %vm30_vm1, %v17_v5  ;;  %vm78_vm3 = vcmask 63488   ;;  %s151_s1 = smov [#allocation2]   ;;  %s101_s23 = sshll.u32 %s193_s3, 4  ;;  %vm92_vm4 = vcmask 57344   ;;  %s102_s23 = int_to_ptr.hbm [resolvable:$true] %s101_s23 }
   0x6   :  { %120 = vset.pattern.permute.xlu2 %v150_v6  ;;  %s99_s2 = sshll.u32 %s151_s1, 4  ;;  %s100_s2 = int_to_ptr.vmem [resolvable:$true] %s99_s2 }
   0x7   :  { %88 = vperm.xlu2 %120, %v18_v1  }
   0xc   :  { %71 = vperm.xlu1 %119, %v19_v7   ;;  %27 = vperm.xlu0 %118, %v19_v7  }
  0x14   :  { %121 = vset.pattern.permute.xlu0 %v150_v6 }
  0x61   :  { %v89_v28 = vpop.permute.xlu2 %88 }
  0x76   :  { %v23_v8 = vpop.permute.xlu0 %22  ;;  %v68_v9 = vpop.permute.xlu1 %67 }
  0x7e   :  { %v28_v10 = vpop.permute.xlu0 %27  ;;  %v72_v17 = vpop.permute.xlu1 %71 }
  0x82   :  { %v58_v11 = vpop.f32.mrf.mxu0  ;;  %v61_v12 = vpop.f32.mrf.mxu1 }
  0x83   :  { %v59_v13 = vadd.f32 %v58_v11, %v23_v8  ;;  %v62_v14 = vadd.f32 %v61_v12, %v28_v10 }
  0x85   :  { %v64_v15 = vmax.f32 %v59_v13, 0.0  ;;  %v65_v16 = vmax.f32 %v62_v14, 0.0 }
  0x87   :  { %v74_v18 = vmul.f32 %v68_v9, %v64_v15  ;;  %v75_v19 = vmul.f32 %v72_v17, %v65_v16 }
  0x89   :  { %v77_v20 = vsel %vm76_vm2, %v74_v18, 0.0  ;;  %v79_v21 = vsel %vm78_vm3, %v75_v19, 0.0 }
  0x8a   :  { %v80_v22 = vadd.f32 %v79_v21, %v77_v20 }
  0x8c   :  { %v81_v23 = vrot.slane %v80_v22, 4 }
  0x8e   :  { %v82_v24 = vadd.f32 %v81_v23, %v80_v22 }
  0x90   :  { %v83_v25 = vrot.slane %v82_v24, 2 }
  0x92   :  { %v84_v26 = vadd.f32 %v83_v25, %v82_v24 }
  0x94   :  { %v85_v27 = vrot.slane %v84_v26, 1 }
  0x96   :  { %v86_v29 = vadd.f32 %v85_v27, %v84_v26 }
  0x98   :  { %v91_v30 = vadd.f32 %v89_v28, %v86_v29 }
  0x9a   :  { %93 = vst.msk [vmem:[#allocation2] sm:$0x1] %vm92_vm4, %v91_v30 }
  0x9b   :  { %104 = dma.vmem_to_hbm [thread:$0]  %s100_s2, 16, %s102_s23, [#allocation3]  }
  0x9c   :  { %146 = dma.done.wait [#allocation3], 16  }
  0x9d   :  { %147 = vsyncadd [#allocation3], 4294967280 }
  0x9e   :  { %109 = vsyncpa [#allocation3], 1 }

</bundles_post_ra>
